<compile_context>
chip_gen: v5e
topology: v5e:2x2
jax: 0.10.0
libtpu: 0.0.40
codegen_flags: <defaults>
</compile_context>

<pallas_src>
import functools

import jax
import jax.numpy as jnp
from jax.experimental import pallas as pl
from jax.experimental.pallas import tpu as pltpu

_HIDDEN = 128  # hidden width of both MLPs (already 128-aligned)


def _round_up(x, m):
    return (x + m - 1) // m * m


def _cdiv(a, b):
    return -(-a // b)


# --------------------------------------------------------------------------- #
# Kernel
# --------------------------------------------------------------------------- #
def _hyperprior_kernel(y_ref, nvar_ref, noise_ref,                 # activations
                       w1y_ref, w1s_ref, b1_ref, w2_ref, b2_ref,   # encoder
                       w3_ref, b3_ref, w4_ref, b4_ref,             # decoder
                       zt_ref, params_ref,                         # outputs
                       *, training: bool):
    y = y_ref[...]                                   # (TB, D)   f32
    snr = -jnp.log(nvar_ref[...])                    # (TB, 1)   f32 == log(1/n_var)

    # ---- encoder: Linear -> ReLU -> Linear (bf16 MXU, f32 accumulate) -------
    h1 = jnp.dot(y.astype(jnp.bfloat16), w1y_ref[...],
                 preferred_element_type=jnp.float32)
    h1 = h1 + snr * w1s_ref[...] + b1_ref[...]       # rank-1 SNR term + bias
    h1 = jnp.maximum(h1, 0.0)

    z = jnp.dot(h1.astype(jnp.bfloat16), w2_ref[...],
                preferred_element_type=jnp.float32) + b2_ref[...]

    # ---- quantization proxy (f32) -------------------------------------------
    if training:
        z_tilde = z + noise_ref[...] - 0.5
    else:
        z_tilde = jnp.round(z)
    zt_ref[...] = z_tilde

    # ---- decoder: Linear -> ReLU -> Linear ----------------------------------
    # (padded rows of w3 are zero, so noise in padded z columns has no effect)
    h2 = jnp.dot(z_tilde.astype(jnp.bfloat16), w3_ref[...],
                 preferred_element_type=jnp.float32) + b3_ref[...]
    h2 = jnp.maximum(h2, 0.0)
    params_ref[...] = (
        jnp.dot(h2.astype(jnp.bfloat16), w4_ref[...],
                preferred_element_type=jnp.float32) + b4_ref[...]
    )


# --------------------------------------------------------------------------- #
# Parameter init (torch nn.Linear style)
# --------------------------------------------------------------------------- #
def init_hyperprior_params(key, d_model, num_modulations=1):
    ks = jax.random.split(key, 8)

    def lin(kw, kb, fan_in, fan_out):
        bound = 1.0 / jnp.sqrt(fan_in)
        w = jax.random.uniform(kw, (fan_in, fan_out), jnp.float32, -bound, bound)
        b = jax.random.uniform(kb, (1, fan_out), jnp.float32, -bound, bound)
        return w, b

    w1, b1 = lin(ks[0], ks[1], d_model + 1, _HIDDEN)
    w2, b2 = lin(ks[2], ks[3], _HIDDEN, d_model)
    w3, b3 = lin(ks[4], ks[5], d_model, _HIDDEN)
    w4, b4 = lin(ks[6], ks[7], _HIDDEN, 2 * d_model + num_modulations)
    return dict(w1=w1, b1=b1, w2=w2, b2=b2, w3=w3, b3=b3, w4=w4, b4=b4)


# --------------------------------------------------------------------------- #
# Tiling choice: balanced, 8-aligned tiles; >= 2 grid steps whenever possible
# (so the "parallel" batch axis can shard across both TCs on v7x).
# --------------------------------------------------------------------------- #
def _choose_tiling(B, tile_b_max):
    b8 = _round_up(B, 8)
    if b8 <= 8:
        return 8, 8, 1
    n_tiles = max(2, _cdiv(b8, tile_b_max))
    tile_b = _round_up(_cdiv(b8, n_tiles), 8)
    b_pad = _round_up(b8, tile_b)
    return tile_b, b_pad, b_pad // tile_b


# --------------------------------------------------------------------------- #
# Wrapper (jitted: pre-glue + pallas_call + split/softplus epilogue fuse)
# --------------------------------------------------------------------------- #
@functools.partial(jax.jit,
                   static_argnames=("num_modulations", "training", "tile_b_max"))
def hyperprior_forward(y, n_var, params, key, *, num_modulations=1,
                       training=True, tile_b_max=2048):
    B, D = y.shape
    d_pad = _round_up(D, 128)
    p_out = _round_up(2 * D + num_modulations, 128)
    tile_b, b_pad, nb = _choose_tiling(B, tile_b_max)

    # ---- weights: split w1 into (y-part, snr-row); zero-pad; bf16 for MXU ---
    w1 = params["w1"]                                     # (D+1, 128)
    w1y = w1[:D].astype(jnp.bfloat16)                     # (D, 128)
    w1s = w1[D:D + 1]                                     # (1, 128) f32
    b1 = params["b1"]                                     # (1, 128) f32
    w2 = jnp.pad(params["w2"], ((0, 0), (0, d_pad - D))).astype(jnp.bfloat16)
    b2 = jnp.pad(params["b2"], ((0, 0), (0, d_pad - D)))
    w3 = jnp.pad(params["w3"], ((0, d_pad - D), (0, 0))).astype(jnp.bfloat16)
    b3 = params["b3"]
    w4 = jnp.pad(params["w4"],
                 ((0, 0), (0, p_out - (2 * D + num_modulations)))).astype(jnp.bfloat16)
    b4 = jnp.pad(params["b4"], ((0, 0), (0, p_out - (2 * D + num_modulations))))

    # ---- activations: keep y as-is (no concat/pad materialization) ----------
    y_in = jnp.pad(y.astype(jnp.float32), ((0, b_pad - B), (0, 0)))
    nvar_in = jnp.pad(n_var.astype(jnp.float32)[:, None],
                      ((0, b_pad - B), (0, 0)), constant_values=1.0)
    if training:
        noise = jax.random.uniform(key, (b_pad, d_pad), jnp.float32)
    else:
        noise = jnp.zeros((b_pad, d_pad), jnp.float32)

    kernel = functools.partial(_hyperprior_kernel, training=training)

    row_map = lambda i: (i, 0)     # tiled over batch
    const_map = lambda i: (0, 0)   # VMEM-resident across all steps

    grid_spec = pltpu.PrefetchScalarGridSpec(
        num_scalar_prefetch=0,
        grid=(nb,),
        in_specs=[
            pl.BlockSpec((tile_b, D), row_map),          # y
            pl.BlockSpec((tile_b, 1), row_map),          # n_var
            pl.BlockSpec((tile_b, d_pad), row_map),      # noise
            pl.BlockSpec((D, _HIDDEN), const_map),       # w1y (bf16)
            pl.BlockSpec((1, _HIDDEN), const_map),       # w1 snr row (f32)
            pl.BlockSpec((1, _HIDDEN), const_map),       # b1
            pl.BlockSpec((_HIDDEN, d_pad), const_map),   # w2 (bf16)
            pl.BlockSpec((1, d_pad), const_map),         # b2
            pl.BlockSpec((d_pad, _HIDDEN), const_map),   # w3 (bf16)
            pl.BlockSpec((1, _HIDDEN), const_map),       # b3
            pl.BlockSpec((_HIDDEN, p_out), const_map),   # w4 (bf16)
            pl.BlockSpec((1, p_out), const_map),         # b4
        ],
        out_specs=(
            pl.BlockSpec((tile_b, d_pad), row_map),      # z_tilde (padded)
            pl.BlockSpec((tile_b, p_out), row_map),      # decoder params (padded)
        ),
    )

    flops = 2 * b_pad * (D * _HIDDEN + _HIDDEN * d_pad
                         + d_pad * _HIDDEN + _HIDDEN * p_out)
    bytes_accessed = (
        4 * b_pad * (D + 1 + d_pad)                       # y, n_var, noise reads
        + 4 * b_pad * (d_pad + p_out)                     # output writes
        + 2 * (D * _HIDDEN + _HIDDEN * d_pad + d_pad * _HIDDEN + _HIDDEN * p_out)
        + 4 * (3 * _HIDDEN + d_pad + p_out)               # f32 snr row + biases
    )

    z_tilde_pad, params_pad = pl.pallas_call(
        kernel,
        out_shape=(
            jax.ShapeDtypeStruct((b_pad, d_pad), jnp.float32),
            jax.ShapeDtypeStruct((b_pad, p_out), jnp.float32),
        ),
        grid_spec=grid_spec,
        compiler_params=pltpu.CompilerParams(
            dimension_semantics=("parallel",),
            vmem_limit_bytes=32 * 1024 * 1024,
        ),
        cost_estimate=pl.CostEstimate(
            flops=flops, transcendentals=b_pad, bytes_accessed=bytes_accessed),
    )(y_in, nvar_in, noise,
      w1y, w1s, b1, w2, b2, w3, b3, w4, b4)

    # wrapper-side split + softplus (fuses under jit)
    z_tilde = z_tilde_pad[:B, :D]
    dec = params_pad[:B, :2 * D + num_modulations]
    mu = dec[:, :D]
    raw_sigma = dec[:, D:2 * D]
    mod_logits = dec[:, 2 * D:]
    # F.softplus with threshold=20 (numerically stable)
    sigma = jnp.where(raw_sigma > 20.0,
                      raw_sigma,
                      jnp.log1p(jnp.exp(jnp.minimum(raw_sigma, 20.0))))
    return z_tilde, mu, sigma, mod_logits


# --------------------------------------------------------------------------- #
# Demo / smoke test
# --------------------------------------------------------------------------- #
if __name__ == "__main__":
    d_model = 32
    num_modulations = 1
    B = 2

    root = jax.random.PRNGKey(0)
    k_param, k_y, k_nvar, k_noise = jax.random.split(root, 4)

    params = init_hyperprior_params(k_param, d_model, num_modulations)
    y = jax.random.normal(k_y, (B, d_model), dtype=jnp.float32)
    n_var = jax.random.uniform(k_nvar, (B,), dtype=jnp.float32,
                               minval=0.05, maxval=1.0)

    # training mode (uniform quantization noise)
    z_tilde, mu, sigma, mod_logits = hyperprior_forward(
        y, n_var, params, k_noise,
        num_modulations=num_modulations, training=True)
    jax.block_until_ready((z_tilde, mu, sigma, mod_logits))

    assert z_tilde.shape == (B, d_model)
    assert mu.shape == (B, d_model)
    assert sigma.shape == (B, d_model)
    assert mod_logits.shape == (B, num_modulations)
    assert bool(jnp.all(sigma >= 0.0))
    assert bool(jnp.all(jnp.isfinite(z_tilde)))
    assert bool(jnp.all(jnp.isfinite(mu)))

    # eval mode (rounding path) also exercised
    z_e, mu_e, sig_e, mod_e = hyperprior_forward(
        y, n_var, params, k_noise,
        num_modulations=num_modulations, training=False)
    jax.block_until_ready((z_e, mu_e, sig_e, mod_e))
    assert bool(jnp.all(z_e == jnp.round(z_e)))

    print("KERNEL_OK")
</pallas_src>

<mosaic_0001>
module attributes {stable_mosaic.version = 11 : i64} {
  func.func @_hyperprior_kernel(%arg0: i32, %arg1: memref<8x32xf32, #tpu.memory_space<vmem>>, %arg2: memref<8x1xf32, #tpu.memory_space<vmem>>, %arg3: memref<8x128xf32, #tpu.memory_space<vmem>>, %arg4: memref<32x128xbf16, #tpu.memory_space<vmem>>, %arg5: memref<1x128xf32, #tpu.memory_space<vmem>>, %arg6: memref<1x128xf32, #tpu.memory_space<vmem>>, %arg7: memref<128x128xbf16, #tpu.memory_space<vmem>>, %arg8: memref<1x128xf32, #tpu.memory_space<vmem>>, %arg9: memref<128x128xbf16, #tpu.memory_space<vmem>>, %arg10: memref<1x128xf32, #tpu.memory_space<vmem>>, %arg11: memref<128x128xbf16, #tpu.memory_space<vmem>>, %arg12: memref<1x128xf32, #tpu.memory_space<vmem>>, %arg13: memref<8x128xf32, #tpu.memory_space<vmem>>, %arg14: memref<8x128xf32, #tpu.memory_space<vmem>>) attributes {dimension_semantics = [#tpu.dimension_semantics<parallel>], iteration_bounds = array<i64: 1>, scalar_prefetch = 0 : i64, scratch_operands = 0 : i64, tpu.core_type = #tpu.core_type<tc>, window_params = [{transform_indices = @transform_0, window_bounds = array<i64: 8, 32>}, {transform_indices = @transform_1, window_bounds = array<i64: 8, 1>}, {transform_indices = @transform_2, window_bounds = array<i64: 8, 128>}, {pipeline_mode = #tpu.pipeline_mode<synchronous>, transform_indices = @transform_3, window_bounds = array<i64: 32, 128>}, {pipeline_mode = #tpu.pipeline_mode<synchronous>, transform_indices = @transform_4, window_bounds = array<i64: 1, 128>}, {pipeline_mode = #tpu.pipeline_mode<synchronous>, transform_indices = @transform_5, window_bounds = array<i64: 1, 128>}, {pipeline_mode = #tpu.pipeline_mode<synchronous>, transform_indices = @transform_6, window_bounds = array<i64: 128, 128>}, {pipeline_mode = #tpu.pipeline_mode<synchronous>, transform_indices = @transform_7, window_bounds = array<i64: 1, 128>}, {pipeline_mode = #tpu.pipeline_mode<synchronous>, transform_indices = @transform_8, window_bounds = array<i64: 128, 128>}, {pipeline_mode = #tpu.pipeline_mode<synchronous>, transform_indices = @transform_9, window_bounds = array<i64: 1, 128>}, {pipeline_mode = #tpu.pipeline_mode<synchronous>, transform_indices = @transform_10, window_bounds = array<i64: 128, 128>}, {pipeline_mode = #tpu.pipeline_mode<synchronous>, transform_indices = @transform_11, window_bounds = array<i64: 1, 128>}, {transform_indices = @transform_12, window_bounds = array<i64: 8, 128>}, {transform_indices = @transform_13, window_bounds = array<i64: 8, 128>}]} {
    %c0 = arith.constant 0 : index
    %c0_0 = arith.constant 0 : index
    %0 = vector.load %arg1[%c0, %c0_0] : memref<8x32xf32, #tpu.memory_space<vmem>>, vector<8x32xf32>
    %c0_1 = arith.constant 0 : index
    %c0_2 = arith.constant 0 : index
    %1 = vector.load %arg2[%c0_1, %c0_2] : memref<8x1xf32, #tpu.memory_space<vmem>>, vector<8x1xf32>
    %2 = math.log %1 : vector<8x1xf32>
    %cst = arith.constant 0.000000e+00 : f32
    %3 = vector.broadcast %cst : f32 to vector<8x1xf32>
    %4 = arith.subf %3, %2 : vector<8x1xf32>
    %5 = arith.truncf %0 : vector<8x32xf32> to vector<8x32xbf16>
    %c0_3 = arith.constant 0 : index
    %c0_4 = arith.constant 0 : index
    %6 = vector.load %arg4[%c0_3, %c0_4] : memref<32x128xbf16, #tpu.memory_space<vmem>>, vector<32x128xbf16>
    %cst_5 = arith.constant dense<0.000000e+00> : vector<8x128xf32>
    %7 = tpu.matmul %5, %6, %cst_5 {dimension_numbers = #tpu.dot_dimension_numbers<[1], [0], [0], [1], [0, 0, 1, 1], [], []>} : vector<8x32xbf16>, vector<32x128xbf16>, vector<8x128xf32> -> vector<8x128xf32>
    %c0_6 = arith.constant 0 : index
    %c0_7 = arith.constant 0 : index
    %8 = vector.load %arg5[%c0_6, %c0_7] : memref<1x128xf32, #tpu.memory_space<vmem>>, vector<1x128xf32>
    %9 = vector.broadcast %4 : vector<8x1xf32> to vector<8x128xf32>
    %10 = vector.broadcast %8 : vector<1x128xf32> to vector<8x128xf32>
    %11 = arith.mulf %9, %10 : vector<8x128xf32>
    %12 = arith.addf %7, %11 : vector<8x128xf32>
    %c0_8 = arith.constant 0 : index
    %c0_9 = arith.constant 0 : index
    %13 = vector.load %arg6[%c0_8, %c0_9] : memref<1x128xf32, #tpu.memory_space<vmem>>, vector<1x128xf32>
    %14 = vector.broadcast %13 : vector<1x128xf32> to vector<8x128xf32>
    %15 = arith.addf %12, %14 : vector<8x128xf32>
    %cst_10 = arith.constant 0.000000e+00 : f32
    %16 = vector.broadcast %cst_10 : f32 to vector<8x128xf32>
    %17 = arith.maximumf %15, %16 : vector<8x128xf32>
    %18 = arith.truncf %17 : vector<8x128xf32> to vector<8x128xbf16>
    %c0_11 = arith.constant 0 : index
    %c0_12 = arith.constant 0 : index
    %19 = vector.load %arg7[%c0_11, %c0_12] : memref<128x128xbf16, #tpu.memory_space<vmem>>, vector<128x128xbf16>
    %cst_13 = arith.constant dense<0.000000e+00> : vector<8x128xf32>
    %20 = tpu.matmul %18, %19, %cst_13 {dimension_numbers = #tpu.dot_dimension_numbers<[1], [0], [0], [1], [0, 0, 1, 1], [], []>} : vector<8x128xbf16>, vector<128x128xbf16>, vector<8x128xf32> -> vector<8x128xf32>
    %c0_14 = arith.constant 0 : index
    %c0_15 = arith.constant 0 : index
    %21 = vector.load %arg8[%c0_14, %c0_15] : memref<1x128xf32, #tpu.memory_space<vmem>>, vector<1x128xf32>
    %22 = vector.broadcast %21 : vector<1x128xf32> to vector<8x128xf32>
    %23 = arith.addf %20, %22 : vector<8x128xf32>
    %c0_16 = arith.constant 0 : index
    %c0_17 = arith.constant 0 : index
    %24 = vector.load %arg3[%c0_16, %c0_17] : memref<8x128xf32, #tpu.memory_space<vmem>>, vector<8x128xf32>
    %25 = arith.addf %23, %24 : vector<8x128xf32>
    %cst_18 = arith.constant 5.000000e-01 : f32
    %26 = vector.broadcast %cst_18 : f32 to vector<8x128xf32>
    %27 = arith.subf %25, %26 : vector<8x128xf32>
    %c0_19 = arith.constant 0 : index
    %c0_20 = arith.constant 0 : index
    %28 = vector.load %arg13[%c0_19, %c0_20] : memref<8x128xf32, #tpu.memory_space<vmem>>, vector<8x128xf32>
    tpu.vector_store %arg13[%c0_19, %c0_20], %27 {strides = array<i32>} : memref<8x128xf32, #tpu.memory_space<vmem>>, vector<8x128xf32>,
    %29 = arith.truncf %27 : vector<8x128xf32> to vector<8x128xbf16>
    %c0_21 = arith.constant 0 : index
    %c0_22 = arith.constant 0 : index
    %30 = vector.load %arg9[%c0_21, %c0_22] : memref<128x128xbf16, #tpu.memory_space<vmem>>, vector<128x128xbf16>
    %cst_23 = arith.constant dense<0.000000e+00> : vector<8x128xf32>
    %31 = tpu.matmul %29, %30, %cst_23 {dimension_numbers = #tpu.dot_dimension_numbers<[1], [0], [0], [1], [0, 0, 1, 1], [], []>} : vector<8x128xbf16>, vector<128x128xbf16>, vector<8x128xf32> -> vector<8x128xf32>
    %c0_24 = arith.constant 0 : index
    %c0_25 = arith.constant 0 : index
    %32 = vector.load %arg10[%c0_24, %c0_25] : memref<1x128xf32, #tpu.memory_space<vmem>>, vector<1x128xf32>
    %33 = vector.broadcast %32 : vector<1x128xf32> to vector<8x128xf32>
    %34 = arith.addf %31, %33 : vector<8x128xf32>
    %cst_26 = arith.constant 0.000000e+00 : f32
    %35 = vector.broadcast %cst_26 : f32 to vector<8x128xf32>
    %36 = arith.maximumf %34, %35 : vector<8x128xf32>
    %37 = arith.truncf %36 : vector<8x128xf32> to vector<8x128xbf16>
    %c0_27 = arith.constant 0 : index
    %c0_28 = arith.constant 0 : index
    %38 = vector.load %arg11[%c0_27, %c0_28] : memref<128x128xbf16, #tpu.memory_space<vmem>>, vector<128x128xbf16>
    %cst_29 = arith.constant dense<0.000000e+00> : vector<8x128xf32>
    %39 = tpu.matmul %37, %38, %cst_29 {dimension_numbers = #tpu.dot_dimension_numbers<[1], [0], [0], [1], [0, 0, 1, 1], [], []>} : vector<8x128xbf16>, vector<128x128xbf16>, vector<8x128xf32> -> vector<8x128xf32>
    %c0_30 = arith.constant 0 : index
    %c0_31 = arith.constant 0 : index
    %40 = vector.load %arg12[%c0_30, %c0_31] : memref<1x128xf32, #tpu.memory_space<vmem>>, vector<1x128xf32>
    %41 = vector.broadcast %40 : vector<1x128xf32> to vector<8x128xf32>
    %42 = arith.addf %39, %41 : vector<8x128xf32>
    %c0_32 = arith.constant 0 : index
    %c0_33 = arith.constant 0 : index
    %43 = vector.load %arg14[%c0_32, %c0_33] : memref<8x128xf32, #tpu.memory_space<vmem>>, vector<8x128xf32>
    tpu.vector_store %arg14[%c0_32, %c0_33], %42 {strides = array<i32>} : memref<8x128xf32, #tpu.memory_space<vmem>>, vector<8x128xf32>,
    return
  }
  func.func @transform_0(%arg0: i32) -> (i32, i32) {
    %c0_i32 = arith.constant 0 : i32
    %c0_i32_0 = arith.constant 0 : i32
    return %arg0, %c0_i32 : i32, i32
  }
  func.func @transform_1(%arg0: i32) -> (i32, i32) {
    %c0_i32 = arith.constant 0 : i32
    %c0_i32_0 = arith.constant 0 : i32
    return %arg0, %c0_i32 : i32, i32
  }
  func.func @transform_2(%arg0: i32) -> (i32, i32) {
    %c0_i32 = arith.constant 0 : i32
    %c0_i32_0 = arith.constant 0 : i32
    return %arg0, %c0_i32 : i32, i32
  }
  func.func @transform_3(%arg0: i32) -> (i32, i32) {
    %c0_i32 = arith.constant 0 : i32
    %c0_i32_0 = arith.constant 0 : i32
    %c0_i32_1 = arith.constant 0 : i32
    return %c0_i32, %c0_i32_0 : i32, i32
  }
  func.func @transform_4(%arg0: i32) -> (i32, i32) {
    %c0_i32 = arith.constant 0 : i32
    %c0_i32_0 = arith.constant 0 : i32
    %c0_i32_1 = arith.constant 0 : i32
    return %c0_i32, %c0_i32_0 : i32, i32
  }
  func.func @transform_5(%arg0: i32) -> (i32, i32) {
    %c0_i32 = arith.constant 0 : i32
    %c0_i32_0 = arith.constant 0 : i32
    %c0_i32_1 = arith.constant 0 : i32
    return %c0_i32, %c0_i32_0 : i32, i32
  }
  func.func @transform_6(%arg0: i32) -> (i32, i32) {
    %c0_i32 = arith.constant 0 : i32
    %c0_i32_0 = arith.constant 0 : i32
    %c0_i32_1 = arith.constant 0 : i32
    return %c0_i32, %c0_i32_0 : i32, i32
  }
  func.func @transform_7(%arg0: i32) -> (i32, i32) {
    %c0_i32 = arith.constant 0 : i32
    %c0_i32_0 = arith.constant 0 : i32
    %c0_i32_1 = arith.constant 0 : i32
    return %c0_i32, %c0_i32_0 : i32, i32
  }
  func.func @transform_8(%arg0: i32) -> (i32, i32) {
    %c0_i32 = arith.constant 0 : i32
    %c0_i32_0 = arith.constant 0 : i32
    %c0_i32_1 = arith.constant 0 : i32
    return %c0_i32, %c0_i32_0 : i32, i32
  }
  func.func @transform_9(%arg0: i32) -> (i32, i32) {
    %c0_i32 = arith.constant 0 : i32
    %c0_i32_0 = arith.constant 0 : i32
    %c0_i32_1 = arith.constant 0 : i32
    return %c0_i32, %c0_i32_0 : i32, i32
  }
  func.func @transform_10(%arg0: i32) -> (i32, i32) {
    %c0_i32 = arith.constant 0 : i32
    %c0_i32_0 = arith.constant 0 : i32
    %c0_i32_1 = arith.constant 0 : i32
    return %c0_i32, %c0_i32_0 : i32, i32
  }
  func.func @transform_11(%arg0: i32) -> (i32, i32) {
    %c0_i32 = arith.constant 0 : i32
    %c0_i32_0 = arith.constant 0 : i32
    %c0_i32_1 = arith.constant 0 : i32
    return %c0_i32, %c0_i32_0 : i32, i32
  }
  func.func @transform_12(%arg0: i32) -> (i32, i32) {
    %c0_i32 = arith.constant 0 : i32
    %c0_i32_0 = arith.constant 0 : i32
    return %arg0, %c0_i32 : i32, i32
  }
  func.func @transform_13(%arg0: i32) -> (i32, i32) {
    %c0_i32 = arith.constant 0 : i32
    %c0_i32_0 = arith.constant 0 : i32
    return %arg0, %c0_i32 : i32, i32
  }
}

</mosaic_0001>

<bundles_post_ra>
// kernel: hyperprior_forward.1
= control target key start
LH: loop header
LB: loop body
LE: loop exit
PB: predicated region body
PF: predicated region fallthrough
CT: control target
= control target key end

     0   :  { %v500_v1 = vmov 0   ;;  %vm76_vm0 = vcmask 261120   ;;  %s679_s3 = inlined_call_operand.vmem [shape: bf16[32,128], index: 3, kind: input, shape index: {}]   ;;  %s680_s0 = inlined_call_operand.vmem [shape: f32[8,32], index: 0, kind: input, shape index: {}]   ;;  %s681_s1 = inlined_call_operand.vmem [shape: f32[8,1], index: 1, kind: input, shape index: {}]   ;;  %s682_s6 = inlined_call_operand.vmem [shape: bf16[128,128], index: 6, kind: input, shape index: {}]   ;;  %s683_s4 = inlined_call_operand.vmem [shape: f32[1,128], index: 4, kind: input, shape index: {}]   ;;  %s684_s5 = inlined_call_operand.vmem [shape: f32[1,128], index: 5, kind: input, shape index: {}]   ;;  %s685_s7 = inlined_call_operand.vmem [shape: f32[1,128], index: 7, kind: input, shape index: {}]   ;;  %s686_s8 = inlined_call_operand.vmem [shape: bf16[128,128], index: 8, kind: input, shape index: {}]   ;;  %s687_s9 = inlined_call_operand.vmem [shape: f32[1,128], index: 9, kind: input, shape index: {}]   ;;  %s688_s10 = inlined_call_operand.vmem [shape: bf16[128,128], index: 10, kind: input, shape index: {}]   ;;  %s689_s2 = inlined_call_operand.vmem [shape: f32[8,128], index: 2, kind: input, shape index: {}]   ;;  %s690_s12 = inlined_call_operand.vmem [shape: f32[8,128], index: 12, kind: output, shape index: {0}]   ;;  %s691_s11 = inlined_call_operand.vmem [shape: f32[1,128], index: 11, kind: input, shape index: {}]   ;;  %s692_s13 = inlined_call_operand.vmem [shape: f32[8,128], index: 13, kind: output, shape index: {1}]  }
   0x1   :  { %v466_v0 = vld [vmem:[%s679_s3 + $0x8] sm:$0xff]  ;;  %492 = vset.pattern.permute.xlu0 %v500_v1  ;;  %v45_v2 = vld [vmem:[%s681_s1] sm:$0xff]  ;;  %v474_v3 = vld [vmem:[%s682_s6 + $0x38] sm:$0xff] }
   0x2   :  { %86 = vmatpush.bf16.msra.mxu0 %v466_v0  ;;  %v465_v4 = vld [vmem:[%s679_s3] sm:$0xff]  ;;  %498 = vlog2.f32 %v45_v2  ;;  %168 = vmatpush.bf16.msra.mxu1 %v474_v3  ;;  %v473_v6 = vld [vmem:[%s682_s6 + $0x30] sm:$0xff]  ;;  %v472_v8 = vld [vmem:[%s682_s6 + $0x28] sm:$0xff] }
   0x3   :  { %v44_v5 = vld [vmem:[%s680_s0] sm:$0xff]  ;;  %v470_v13 = vld [vmem:[%s682_s6 + $0x18] sm:$0xff]  ;;  %v469_v14 = vld [vmem:[%s682_s6 + $0x10] sm:$0xff] }
   0x4   :  { %v49_v7 = vpack.c.bf16 %v44_v5, %v44_v5  ;;  %v471_v12 = vld [vmem:[%s682_s6 + $0x20] sm:$0xff]  ;;  %v468_v15 = vld [vmem:[%s682_s6 + $0x8] sm:$0xff]  ;;  %v482_v17 = vld [vmem:[%s686_s8 + $0x38] sm:$0xff] }
   0x5   :  { %v467_v16 = vld [vmem:[%s682_s6] sm:$0xff]  ;;  %254 = vmatpush.bf16.msra.mxu2 %v482_v17  ;;  %v481_v18 = vld [vmem:[%s686_s8 + $0x30] sm:$0xff]  ;;  %v480_v19 = vld [vmem:[%s686_s8 + $0x28] sm:$0xff] }
   0x6   :  { %87 = vmatpush.bf16.msra.mxu0 %v465_v4  ;;  %169 = vmatpush.bf16.msra.mxu1 %v473_v6  ;;  %v479_v20 = vld [vmem:[%s686_s8 + $0x20] sm:$0xff]  ;;  %v478_v21 = vld [vmem:[%s686_s8 + $0x18] sm:$0xff]  ;;  %v477_v24 = vld [vmem:[%s686_s8 + $0x10] sm:$0xff] }
   0x7   :  { %v493_v22 = vld [vmem:[%s683_s4] ss:$0 sm:$0xff]  ;;  %v476_v33 = vld [vmem:[%s686_s8 + $0x8] sm:$0xff]  ;;  %v490_v35 = vld [vmem:[%s688_s10 + $0x38] sm:$0xff] }
   0x8   :  { %v499_v9 = vpop.eup %498  ;;  %v494_v26 = vld [vmem:[%s684_s5] ss:$0 sm:$0xff]  ;;  %337 = vmatpush.bf16.msra.mxu3 %v490_v35  ;;  %v489_v36 = vld [vmem:[%s688_s10 + $0x30] sm:$0xff]  ;;  %v488_v37 = vld [vmem:[%s688_s10 + $0x28] sm:$0xff] }
   0x9   :  { %367 = vmatmul.msk.bf16.vlgmr.msra.gmra.mxu0 %vm76_vm0, %v49_v7  ;;  %v47_v10 = vmul.f32 0.6931472, %v499_v9  ;;  %255 = vmatpush.bf16.msra.mxu2 %v481_v18  ;;  %v475_v34 = vld [vmem:[%s686_s8] sm:$0xff]  ;;  %v486_v39 = vld [vmem:[%s688_s10 + $0x18] sm:$0xff]  ;;  %v485_v40 = vld [vmem:[%s688_s10 + $0x10] sm:$0xff] }
   0xa   :  { %170 = vmatpush.bf16.msra.mxu1 %v472_v8  ;;  %v487_v38 = vld [vmem:[%s688_s10 + $0x20] sm:$0xff]  ;;  %v484_v49 = vld [vmem:[%s688_s10 + $0x8] sm:$0xff] }
   0xb   :  { %v48_v11 = vsub.f32 0.0, %v47_v10  ;;  %v495_v41 = vld [vmem:[%s685_s7] ss:$0 sm:$0xff] }
   0xc   :  { %338 = vmatpush.bf16.msra.mxu3 %v489_v36  ;;  %v181_v43 = vld [vmem:[%s689_s2] sm:$0xff] }
   0xd   :  { %57 = vperm.xlu0 %492, %v48_v11   ;;  %256 = vmatpush.bf16.msra.mxu2 %v480_v19  ;;  %v483_v50 = vld [vmem:[%s688_s10] sm:$0xff] }
   0xe   :  { %171 = vmatpush.bf16.msra.mxu1 %v471_v12  ;;  %v496_v51 = vld [vmem:[%s687_s9] ss:$0 sm:$0xff] }
   0xf   :  { %v497_v57 = vld [vmem:[%s691_s11] ss:$0 sm:$0xff] }
  0x10   :  { %339 = vmatpush.bf16.msra.mxu3 %v488_v37 }
  0x11   :  { %257 = vmatpush.bf16.msra.mxu2 %v479_v20 }
  0x12   :  { %172 = vmatpush.bf16.msra.mxu1 %v470_v13 }
  0x14   :  { %340 = vmatpush.bf16.msra.mxu3 %v487_v38 }
  0x15   :  { %258 = vmatpush.bf16.msra.mxu2 %v478_v21 }
  0x16   :  { %173 = vmatpush.bf16.msra.mxu1 %v469_v14 }
  0x18   :  { %341 = vmatpush.bf16.msra.mxu3 %v486_v39 }
  0x19   :  { %259 = vmatpush.bf16.msra.mxu2 %v477_v24 }
  0x1a   :  { %174 = vmatpush.bf16.msra.mxu1 %v468_v15 }
  0x1c   :  { %342 = vmatpush.bf16.msra.mxu3 %v485_v40 }
  0x1d   :  { %260 = vmatpush.bf16.msra.mxu2 %v476_v33 }
  0x1e   :  { %175 = vmatpush.bf16.msra.mxu1 %v467_v16 }
  0x20   :  { %343 = vmatpush.bf16.msra.mxu3 %v484_v49 }
  0x21   :  { %261 = vmatpush.bf16.msra.mxu2 %v475_v34 }
  0x24   :  { %344 = vmatpush.bf16.msra.mxu3 %v483_v50 }
  0x7f   :  { %v58_v23 = vpop.permute.xlu0 %57 }
  0x80   :  { %v63_v25 = vmul.f32 %v493_v22, %v58_v23 }
  0x86   :  { %v89_v27 = vpop.f32.mrf.mxu0 }
  0x87   :  { %v90_v28 = vadd.f32 %v89_v27, %v63_v25 }
  0x89   :  { %v97_v29 = vadd.f32 %v494_v26, %v90_v28 }
  0x8b   :  { %v98_v30 = vmax.f32 %v97_v29, 0.0 }
  0x8d   :  { %v99_v31 = vpack.c.bf16 %v98_v30, %v98_v30 }
  0x8e   :  { %v91_v32 = vpop.f32.mrf.mxu0 }
  0x8f   :  { %176 = vmatmul.bf16.vlgmr.msra.gmra.mxu1 %v99_v31 }
 0x10c   :  { %v177_v42 = vpop.f32.mrf.mxu1 }
 0x10d   :  { %v178_v44 = vadd.f32 %v495_v41, %v177_v42 }
 0x10f   :  { %v182_v45 = vadd.f32 %v181_v43, %v178_v44 }
 0x111   :  { %v400_v46 = vadd.f32 -0.5, %v182_v45 }
 0x113   :  { %184 = vst [vmem:[%s690_s12] sm:$0xff] %v400_v46  ;;  %v185_v47 = vpack.c.bf16 %v400_v46, %v400_v46 }
 0x114   :  { %v179_v48 = vpop.f32.mrf.mxu1 }
 0x115   :  { %262 = vmatmul.bf16.vlgmr.msra.gmra.mxu2 %v185_v47 }
 0x198   :  { %v263_v52 = vpop.f32.mrf.mxu2 }
 0x199   :  { %v264_v53 = vadd.f32 %v496_v51, %v263_v52 }
 0x19b   :  { %v267_v54 = vmax.f32 %v264_v53, 0.0 }
 0x19d   :  { %v268_v55 = vpack.c.bf16 %v267_v54, %v267_v54 }
 0x19f   :  { %345 = vmatmul.bf16.vlgmr.msra.gmra.mxu3 %v268_v55 }
 0x1a0   :  { %v265_v56 = vpop.f32.mrf.mxu2 }
 0x222   :  { %v346_v58 = vpop.f32.mrf.mxu3 }
 0x223   :  { %v347_v59 = vadd.f32 %v497_v57, %v346_v58 }
 0x225   :  { %350 = vst [vmem:[%s692_s13] sm:$0xff] %v347_v59 }
 0x22a   :  { %v348_v60 = vpop.f32.mrf.mxu3 }

</bundles_post_ra>
